<compile_context>
chip_gen: v6e
topology: v6e:2x2x1
jax: 0.10.0
libtpu: 0.0.40
codegen_flags: <defaults>
</compile_context>

<pallas_src>
import functools

import jax
import jax.numpy as jnp
from jax import lax
from jax.experimental import pallas as pl
from jax.experimental.pallas import tpu as pltpu


def _roundup(x: int, m: int) -> int:
    return ((x + m - 1) // m) * m


def _padded_block_bytes(bt: int, C: int, N: int) -> int:
    """Padded (tiled-layout) VMEM footprint of one (bt*C, N) float32 input block."""
    return _roundup(bt * C, 8) * _roundup(N, 128) * 4


def _pick_images_per_block(B: int, C: int, N: int, budget_bytes: int) -> int:
    """Largest divisor of B whose padded block fits the budget, leaving >= 2 grid
    steps whenever B >= 2 (so both v7x TensorCores get work)."""
    max_bt = B if B == 1 else B // 2
    for bt in range(max_bt, 0, -1):
        if B % bt == 0 and _padded_block_bytes(bt, C, N) <= budget_bytes:
            return bt
    return 1


def _vmem_capacity_bytes() -> int:
    """Physical per-TensorCore VMEM (v7x: 64 MiB, v5e/v6e: 128 MiB)."""
    try:
        info = pltpu.get_tpu_info()
        cap = int(getattr(info, "vmem_capacity_bytes", 0) or 0)
        if cap > 0:
            return cap
    except Exception:
        pass
    return 64 << 20  # conservative default (v7x per-core VMEM)


def _tv_kernel(H, W, clean_ref, noisy_ref, sq_ref, tv_ref):
    """One grid step: bt images, laid out as (bt*C) rows x (H*W) lanes."""
    x = clean_ref[0]                                     # (R, N) float32
    y = noisy_ref[0]
    R, N = x.shape

    # --- L2 partial: per-(image, channel) sum of squared error ---------------
    d = x - y
    sq = jnp.sum(d * d, axis=1, keepdims=True)           # (R, 1)

    zero = jnp.zeros((R, 1), jnp.float32)

    # --- horizontal (W) differences: pairs (n, n+1), valid iff n % W != W-1 ---
    if W > 1:
        adw = jnp.abs(x[:, 1:] - x[:, :N - 1])           # (R, N-1)
        colw = lax.broadcasted_iota(jnp.int32, (1, N - 1), 1)
        tvw = jnp.sum(jnp.where(colw % W != W - 1, adw, 0.0),
                      axis=1, keepdims=True)             # (R, 1)
    else:
        tvw = zero

    # --- vertical (H) differences: pairs (n, n+W), n < N-W -> all valid -------
    if H > 1:
        adh = jnp.abs(x[:, W:] - x[:, :N - W])           # (R, N-W)
        tvh = jnp.sum(adh, axis=1, keepdims=True)        # (R, 1)
    else:
        tvh = zero

    # Lane-dense stores: full 128-lane vst, no masked partial stores.
    sq_ref[0] = jnp.broadcast_to(sq, (R, 128))
    tv_ref[0] = jnp.broadcast_to(tvw + tvh, (R, 128))


@jax.jit
def _tv_denoise_forward_impl(clean_image, noisy_image):
    B, C, H, W = clean_image.shape
    N = H * W

    # Images per grid step: padded-byte budget of ~4 MiB per input block, and at
    # least two grid steps when B >= 2 (v7x megacore).
    bt = _pick_images_per_block(B, C, N, budget_bytes=4 << 20)
    num_blocks = B // bt
    R = bt * C

    block_bytes = _padded_block_bytes(bt, C, N)
    # 2 inputs x 2 pipeline buffers + ~6 block-sized in-kernel temporaries + slack.
    est_vmem = 10 * block_bytes + (2 << 20)
    cap = _vmem_capacity_bytes()
    vmem_limit = int(min(max(est_vmem, 32 << 20), (cap * 85) // 100))
    # TODO(synk): single images whose padded block cannot be double-buffered under
    # the capped limit (notably v7x's 64 MiB VMEM) need a second grid axis that
    # chunks the flattened spatial dim with a carried boundary column for the
    # cross-chunk H/W differences.

    # Free, contiguous reshapes: rows = (image, channel), lanes = flattened (H, W).
    x3 = clean_image.reshape(num_blocks, R, N)
    y3 = noisy_image.reshape(num_blocks, R, N)

    kernel = functools.partial(_tv_kernel, H, W)

    sq_out, tv_out = pl.pallas_call(
        kernel,
        out_shape=(
            jax.ShapeDtypeStruct((num_blocks, R, 128), jnp.float32),
            jax.ShapeDtypeStruct((num_blocks, R, 128), jnp.float32),
        ),
        grid_spec=pltpu.PrefetchScalarGridSpec(
            num_scalar_prefetch=0,
            grid=(num_blocks,),
            in_specs=[
                pl.BlockSpec((1, R, N), lambda i: (i, 0, 0)),
                pl.BlockSpec((1, R, N), lambda i: (i, 0, 0)),
            ],
            out_specs=(
                pl.BlockSpec((1, R, 128), lambda i: (i, 0, 0)),
                pl.BlockSpec((1, R, 128), lambda i: (i, 0, 0)),
            ),
        ),
        compiler_params=pltpu.CompilerParams(
            # Every grid step owns disjoint output blocks -> safe to shard across
            # the two v7x TensorCores; no-op on single-core v5e/v6e.
            dimension_semantics=("parallel",),
            vmem_limit_bytes=vmem_limit,
        ),
    )(x3, y3)

    # Tiny wrapper glue: fold channels, global MSE mean, torch-module combine.
    sq_rows = sq_out[:, :, 0].reshape(B, C)              # per-(image, channel) sums
    tv_rows = tv_out[:, :, 0].reshape(B, C)
    mse = jnp.sum(sq_rows) / (B * C * H * W)             # MSELoss(reduction='mean')
    tv_per_image = jnp.sum(tv_rows, axis=1)              # kornia TV, per image
    return mse + 1e-4 * tv_per_image                     # scalar + (B,) -> (B,)


def tv_denoise_forward(clean_image, noisy_image):
    """Pallas implementation of TVDenoise.forward(); returns (B,) float32."""
    return _tv_denoise_forward_impl(
        clean_image.astype(jnp.float32), noisy_image.astype(jnp.float32)
    )


def _reference_forward(clean, noisy):
    """Pure-JAX reference mirroring torch/kornia semantics."""
    mse = jnp.mean((clean - noisy) ** 2)
    dh = jnp.abs(clean[:, :, 1:, :] - clean[:, :, :-1, :]).sum(axis=(1, 2, 3))
    dw = jnp.abs(clean[:, :, :, 1:] - clean[:, :, :, :-1]).sum(axis=(1, 2, 3))
    return mse + 1e-4 * (dh + dw)


if __name__ == "__main__":
    key = jax.random.PRNGKey(0)
    B, C, H, W = 2, 4, 16, 16

    # noisy_image: the fixed buffer held by the module.
    noisy_image = jax.random.normal(key, (B, C, H, W), dtype=jnp.float32)

    # clean_image: the nn.Parameter, initialized in __init__ as noisy_image.clone().
    clean_image = noisy_image + 0.0

    out = jax.block_until_ready(tv_denoise_forward(clean_image, noisy_image))
    ref = _reference_forward(clean_image, noisy_image)
    assert out.shape == (B,)
    assert jnp.allclose(out, ref, rtol=1e-5, atol=1e-5), (out, ref)

    # Also exercise a non-trivial L2 term (as if the parameter had been updated).
    clean_updated = noisy_image + 0.05 * jax.random.normal(
        jax.random.PRNGKey(1), (B, C, H, W), dtype=jnp.float32
    )
    out2 = jax.block_until_ready(tv_denoise_forward(clean_updated, noisy_image))
    ref2 = _reference_forward(clean_updated, noisy_image)
    assert jnp.allclose(out2, ref2, rtol=1e-5, atol=1e-5), (out2, ref2)

    print("KERNEL_OK")
</pallas_src>

<mosaic_0001>
module attributes {stable_mosaic.version = 11 : i64} {
  func.func @_tv_kernel(%arg0: i32, %arg1: memref<1x4x256xf32, #tpu.memory_space<vmem>>, %arg2: memref<1x4x256xf32, #tpu.memory_space<vmem>>, %arg3: memref<1x4x128xf32, #tpu.memory_space<vmem>>, %arg4: memref<1x4x128xf32, #tpu.memory_space<vmem>>) attributes {dimension_semantics = [#tpu.dimension_semantics<parallel>], iteration_bounds = array<i64: 2>, scalar_prefetch = 0 : i64, scratch_operands = 0 : i64, tpu.core_type = #tpu.core_type<tc>, window_params = [{transform_indices = @transform_0, window_bounds = array<i64: 1, 4, 256>}, {transform_indices = @transform_1, window_bounds = array<i64: 1, 4, 256>}, {transform_indices = @transform_2, window_bounds = array<i64: 1, 4, 128>}, {transform_indices = @transform_3, window_bounds = array<i64: 1, 4, 128>}]} {
    %c0 = arith.constant 0 : index
    %c0_0 = arith.constant 0 : index
    %c0_1 = arith.constant 0 : index
    %0 = vector.load %arg1[%c0, %c0_0, %c0_1] : memref<1x4x256xf32, #tpu.memory_space<vmem>>, vector<1x4x256xf32>
    %1 = vector.shape_cast %0 : vector<1x4x256xf32> to vector<4x256xf32>
    %c0_2 = arith.constant 0 : index
    %c0_3 = arith.constant 0 : index
    %c0_4 = arith.constant 0 : index
    %2 = vector.load %arg2[%c0_2, %c0_3, %c0_4] : memref<1x4x256xf32, #tpu.memory_space<vmem>>, vector<1x4x256xf32>
    %3 = vector.shape_cast %2 : vector<1x4x256xf32> to vector<4x256xf32>
    %4 = arith.subf %1, %3 : vector<4x256xf32>
    %5 = arith.mulf %4, %4 : vector<4x256xf32>
    %cst = arith.constant dense<0.000000e+00> : vector<4xf32>
    %6 = vector.multi_reduction <add>, %5, %cst [1] : vector<4x256xf32> to vector<4xf32>
    %7 = vector.shape_cast %6 : vector<4xf32> to vector<4x1xf32>
    %8 = vector.extract_strided_slice %1 {offsets = [0, 1], sizes = [4, 255], strides = [1, 1]} : vector<4x256xf32> to vector<4x255xf32>
    %9 = vector.extract_strided_slice %1 {offsets = [0, 0], sizes = [4, 255], strides = [1, 1]} : vector<4x256xf32> to vector<4x255xf32>
    %10 = arith.subf %8, %9 : vector<4x255xf32>
    %11 = math.absf %10 : vector<4x255xf32>
    %12 = tpu.iota {dimensions = array<i32: 1>} : vector<1x255xi32>
    %c16_i32 = arith.constant 16 : i32
    %c0_i32 = arith.constant 0 : i32
    %13 = arith.cmpi eq, %c16_i32, %c0_i32 : i32
    %c1_i32 = arith.constant 1 : i32
    %14 = arith.select %13, %c1_i32, %c16_i32 : i32
    %15 = vector.broadcast %14 : i32 to vector<1x255xi32>
    %16 = arith.remsi %12, %15 : vector<1x255xi32>
    %c0_i32_5 = arith.constant 0 : i32
    %17 = vector.broadcast %c0_i32_5 : i32 to vector<1x255xi32>
    %18 = arith.cmpi ne, %16, %17 : vector<1x255xi32>
    %c0_i32_6 = arith.constant 0 : i32
    %19 = vector.broadcast %c0_i32_6 : i32 to vector<1x255xi32>
    %20 = arith.cmpi slt, %16, %19 : vector<1x255xi32>
    %c0_i32_7 = arith.constant 0 : i32
    %21 = arith.cmpi slt, %14, %c0_i32_7 : i32
    %22 = vector.broadcast %21 : i1 to vector<1x255xi1>
    %23 = vector.broadcast %22 : vector<1x255xi1> to vector<1x255xi1>
    %24 = arith.xori %20, %23 : vector<1x255xi1>
    %25 = arith.andi %24, %18 : vector<1x255xi1>
    %26 = vector.broadcast %14 : i32 to vector<1x255xi32>
    %27 = arith.addi %16, %26 : vector<1x255xi32>
    %28 = arith.select %25, %27, %16 : vector<1x255xi1>, vector<1x255xi32>
    %c15_i32 = arith.constant 15 : i32
    %29 = vector.broadcast %c15_i32 : i32 to vector<1x255xi32>
    %30 = arith.cmpi ne, %28, %29 : vector<1x255xi32>
    %cst_8 = arith.constant 0.000000e+00 : f32
    %31 = vector.shape_cast %30 : vector<1x255xi1> to vector<1x255xi1>
    %32 = vector.broadcast %31 : vector<1x255xi1> to vector<4x255xi1>
    %33 = vector.broadcast %cst_8 : f32 to vector<4x255xf32>
    %34 = arith.select %32, %11, %33 : vector<4x255xi1>, vector<4x255xf32>
    %cst_9 = arith.constant dense<0.000000e+00> : vector<4xf32>
    %35 = vector.multi_reduction <add>, %34, %cst_9 [1] : vector<4x255xf32> to vector<4xf32>
    %36 = vector.shape_cast %35 : vector<4xf32> to vector<4x1xf32>
    %37 = vector.extract_strided_slice %1 {offsets = [0, 16], sizes = [4, 240], strides = [1, 1]} : vector<4x256xf32> to vector<4x240xf32>
    %38 = vector.extract_strided_slice %1 {offsets = [0, 0], sizes = [4, 240], strides = [1, 1]} : vector<4x256xf32> to vector<4x240xf32>
    %39 = arith.subf %37, %38 : vector<4x240xf32>
    %40 = math.absf %39 : vector<4x240xf32>
    %cst_10 = arith.constant dense<0.000000e+00> : vector<4xf32>
    %41 = vector.multi_reduction <add>, %40, %cst_10 [1] : vector<4x240xf32> to vector<4xf32>
    %42 = vector.shape_cast %41 : vector<4xf32> to vector<4x1xf32>
    %43 = vector.shape_cast %7 : vector<4x1xf32> to vector<4x1xf32>
    %44 = vector.broadcast %43 : vector<4x1xf32> to vector<4x128xf32>
    %c0_11 = arith.constant 0 : index
    %c0_12 = arith.constant 0 : index
    %c0_13 = arith.constant 0 : index
    %45 = vector.load %arg3[%c0_11, %c0_12, %c0_13] : memref<1x4x128xf32, #tpu.memory_space<vmem>>, vector<1x4x128xf32>
    %46 = vector.shape_cast %45 : vector<1x4x128xf32> to vector<4x128xf32>
    %47 = vector.shape_cast %44 : vector<4x128xf32> to vector<1x4x128xf32>
    tpu.vector_store %arg3[%c0_11, %c0_12, %c0_13], %47 {strides = array<i32>} : memref<1x4x128xf32, #tpu.memory_space<vmem>>, vector<1x4x128xf32>,
    %48 = arith.addf %36, %42 : vector<4x1xf32>
    %49 = vector.shape_cast %48 : vector<4x1xf32> to vector<4x1xf32>
    %50 = vector.broadcast %49 : vector<4x1xf32> to vector<4x128xf32>
    %c0_14 = arith.constant 0 : index
    %c0_15 = arith.constant 0 : index
    %c0_16 = arith.constant 0 : index
    %51 = vector.load %arg4[%c0_14, %c0_15, %c0_16] : memref<1x4x128xf32, #tpu.memory_space<vmem>>, vector<1x4x128xf32>
    %52 = vector.shape_cast %51 : vector<1x4x128xf32> to vector<4x128xf32>
    %53 = vector.shape_cast %50 : vector<4x128xf32> to vector<1x4x128xf32>
    tpu.vector_store %arg4[%c0_14, %c0_15, %c0_16], %53 {strides = array<i32>} : memref<1x4x128xf32, #tpu.memory_space<vmem>>, vector<1x4x128xf32>,
    return
  }
  func.func @transform_0(%arg0: i32) -> (i32, i32, i32) {
    %c0_i32 = arith.constant 0 : i32
    %c0_i32_0 = arith.constant 0 : i32
    %c0_i32_1 = arith.constant 0 : i32
    return %arg0, %c0_i32, %c0_i32_0 : i32, i32, i32
  }
  func.func @transform_1(%arg0: i32) -> (i32, i32, i32) {
    %c0_i32 = arith.constant 0 : i32
    %c0_i32_0 = arith.constant 0 : i32
    %c0_i32_1 = arith.constant 0 : i32
    return %arg0, %c0_i32, %c0_i32_0 : i32, i32, i32
  }
  func.func @transform_2(%arg0: i32) -> (i32, i32, i32) {
    %c0_i32 = arith.constant 0 : i32
    %c0_i32_0 = arith.constant 0 : i32
    %c0_i32_1 = arith.constant 0 : i32
    return %arg0, %c0_i32, %c0_i32_0 : i32, i32, i32
  }
  func.func @transform_3(%arg0: i32) -> (i32, i32, i32) {
    %c0_i32 = arith.constant 0 : i32
    %c0_i32_0 = arith.constant 0 : i32
    %c0_i32_1 = arith.constant 0 : i32
    return %arg0, %c0_i32, %c0_i32_0 : i32, i32, i32
  }
}

</mosaic_0001>

<bundles_post_ra>
// kernel: _tv_denoise_forward_impl.1
= control target key start
LH: loop header
LB: loop body
LE: loop exit
PB: predicated region body
PF: predicated region fallthrough
CT: control target
= control target key end

     0   :  { %s455_s12 = smov 0   ;;  %s486_s0 = inlined_call_operand.vmem [shape: f32[2,4,256], index: 0, kind: input, shape index: {}]   ;;  %s487_s1 = inlined_call_operand.vmem [shape: f32[2,4,256], index: 1, kind: input, shape index: {}]   ;;  %s488_s2 = inlined_call_operand.vmem [shape: f32[2,4,128], index: 2, kind: output, shape index: {0}]   ;;  %s489_s3 = inlined_call_operand.vmem [shape: f32[2,4,128], index: 3, kind: output, shape index: {1}]  }
   0x1 LB: > { %s396_s13 = sadd.s32 4294967295, %s429_s12   ;;  %p400_p0 = scmp.ge.s32.totalorder %s429_s12, 1  ;;  %s429_s12 = sphi %s455_s12, %s14_s12  }
   0x2   : > { %p150_p1 = scmp.lt.s32.totalorder %s429_s12, 3 }
   0x4   : > { %p151_p2 = pnand %p400_p0, %p150_p1 }
   0x5   : > { %p182_p3 = scmp.lt.s32.totalorder (!%p151_p2), %s396_s13, 1  ;;  %s431_s18 = smov (!%p151_p2), 1  }
   0x6   : > { %154 = sbr.rel (%p151_p2) target bundleno = 405 (0x195), region = 28  ;;  %s432_s19 = smov (!%p151_p2), 16  }
   0x7   : > { %s433_s20 = smov (!%p151_p2), 127   ;;  %s434_s21 = smov (!%p151_p2), 112  }
   0xb   : > { %s491_s13 = smov (!%p182_p3, %s396_s13), 1  ;;  %vm217_vm0 = vcmask 7168   ;;  %vm276_vm1 = vcmask 130048   ;;  %v222_v13 = vlaneseq  ;;  %vm261_vm3 = vcmask 1039360  }
   0xc   : > { %s409_s14 = sshll.u32 %s491_s13, 3  ;;  %vm268_vm5 = vcmask 1035264   ;;  %vm207_vm6 = vcmask 1043456   ;;  %vm287_vm7 = vcmask 916480   ;;  %vm292_vm8 = vcmask 912384   ;;  %s405_s25 = sshll.u32 %s491_s13, 2 }
   0xd   : > { %s186_s17 = scalar_lea.vmem %s486_s0, %s409_s14  ;;  %s191_s24 = scalar_lea.vmem %s487_s1, %s409_s14  ;;  %v223_v14 = vand.u32 127, %v222_v13 }
   0xe   : > { %v200_v0 = vld [vmem:[%s186_s17] sm:$0xff]  ;;  %s195_s28 = scalar_lea.vmem %s488_s2, %s405_s25  ;;  %s199_s4 = scalar_lea.vmem %s489_s3, %s405_s25 }
   0xf   : > { %214 = vrot.lane.b32.xlu0 %v200_v0, %s431_s18  ;;  %v201_v15 = vld [vmem:[%s191_s24] sm:$0xff]  ;;  %v224_v16 = vadd.s32 128, %v223_v14  ;;  %v229_v19 = vand.u32 15, %v223_v14 }
  0x10   : > { %v202_v17 = vsub.f32 %v200_v0, %v201_v15 }
  0x11   : > { %v236_v18 = vand.u32 15, %v224_v16  ;;  %vm249_vm4 = vcmp.ne.s32.totalorder %v229_v19, 15 }
  0x12   : > { %v203_v20 = vmul.f32 %v202_v17, %v202_v17 }
  0x13   : > { %273 = vrot.lane.b32.xlu0 %v200_v0, %s432_s19  ;;  %vm250_vm2 = vcmp.ne.s32.totalorder %v236_v18, 15 }
  0x14   : > { %v205_v22 = vcombine.high %v203_v20, %v203_v20  ;;  %v208_v29 = vsel %vm207_vm6, %v203_v20, 0.0 }
  0x16   : > { %v209_v30 = vsel %vm207_vm6, %v205_v22, 0.0 }
  0x17   : > { %v210_v37 = vadd.f32 %v209_v30, %v208_v29 }
  0x81   : > { %v215_v1 = vpop.permute.xlu0 %214 }
  0x82   : > { %v216_v2 = vrot.slane %v215_v1, 4 }
  0x84   : > { %v218_v3 = vsel %vm217_vm0, %v216_v2, %v215_v1 }
  0x85   : > { %v274_v4 = vpop.permute.xlu0 %273  ;;  %v220_v5 = vsub.f32 %v200_v0, %v218_v3 }
  0x86   : > { %v275_v6 = vrot.slane %v274_v4, 4 }
  0x87   : > { %v221_v7 = vand.u32 2147483647, %v220_v5 }
  0x88   : > { %v277_v8 = vsel %vm276_vm1, %v275_v6, %v274_v4 }
  0x89   : > { %v279_v9 = vsub.f32 %v200_v0, %v277_v8  ;;  %257 = vrot.lane.b32.xlu1 %v221_v7, %s433_s20  ;;  %v256_v11 = vcombine.high %v221_v7, %v221_v7 }
  0x8b   : > { %v280_v10 = vand.u32 2147483647, %v279_v9 }
  0x8d   : > { %259 = vrot.lane.b32.xlu1 %v256_v11, %s433_s20  ;;  %283 = vrot.lane.b32.xlu0 %v280_v10, %s434_s21  ;;  %v282_v12 = vcombine.high %v280_v10, %v280_v10 }
  0x91   : > { %285 = vrot.lane.b32.xlu1 %v282_v12, %s434_s21 }
  0xfb   : > { %v258_v21 = vpop.permute.xlu1 %257 }
  0xff   : > { %v260_v23 = vpop.permute.xlu1 %259  ;;  %v284_v31 = vpop.permute.xlu0 %283 }
 0x100   : > { %v262_v24 = vsel %vm261_vm3, %v258_v21, %v260_v23  ;;  %v266_v25 = vsel %vm250_vm2, %v260_v23, 0.0 }
 0x101   : > { %v265_v26 = vsel %vm249_vm4, %v262_v24, 0.0  ;;  %v269_v27 = vsel %vm268_vm5, %v266_v25, 0.0 }
 0x102   : > { %v267_v28 = vsel %vm207_vm6, %v265_v26, 0.0 }
 0x103   : > { %v286_v32 = vpop.permute.xlu1 %285  ;;  %v270_v33 = vadd.f32 %v269_v27, %v267_v28 }
 0x104   : > { %v288_v34 = vsel %vm287_vm7, %v284_v31, %v286_v32  ;;  %v293_v35 = vsel %vm292_vm8, %v286_v32, 0.0 }
 0x105   : > { %271 = vadd.xlane.f32.xlu0 %v270_v33  ;;  %v291_v36 = vsel %vm207_vm6, %v288_v34, 0.0 }
 0x106   : > { %v294_v38 = vadd.f32 %v293_v35, %v291_v36 }
 0x108   : > { %295 = vadd.xlane.f32.xlu1 %v294_v38 }
 0x109   : > { %211 = vadd.xlane.f32.xlu0 %v210_v37 }
 0x18e   : > { %v272_v39 = vpop.xlane.xlu0 %271 }
 0x191   : > { %v296_v40 = vpop.xlane.xlu1 %295 }
 0x192   : > { %v298_v41 = vadd.f32 %v296_v40, %v272_v39  ;;  %v212_v42 = vpop.xlane.xlu0 %211 }
 0x193   : > { %297 = vst [vmem:[%s195_s28] sm:$0xf] %v212_v42 }
 0x194   : > { %299 = vst [vmem:[%s199_s4] sm:$0xf] %v298_v41 }
 0x195 PF: > { %s14_s12 = sadd.s32 1, %s429_s12  }
 0x196   : > { %p11_p4 = scmp.ge.s32.totalorder %s14_s12, 4  }
 0x198   :  { %13 = sbr.rel (!%p11_p4) target bundleno = 1 (0x1), region = 73 }

</bundles_post_ra>
